<compile_context>
chip_gen: v7x
topology: tpu7x:2x2x1
jax: 0.10.0
libtpu: 0.0.40
codegen_flags: <defaults>
</compile_context>

<pallas_src>
import jax
import jax.numpy as jnp
from jax.experimental import pallas as pl
from jax.experimental.pallas import tpu as pltpu

_FC_PAD = 128  # pad fc output columns to one full 128-lane vreg (lane-dense store)


# ---------------------------------------------------------------------------
# Fused Pallas kernel: all LSTM layers (both directions) + final Linear
# ---------------------------------------------------------------------------

def _make_fused_kernel(num_layers, hidden_size, seg, fc_pad):
    H = hidden_size
    g6 = 6 * H          # fused gate columns per layer: [i_f,i_b | g_f,g_b | o_f,o_b]
    h2 = 2 * H          # concatenated [h_fwd | h_bwd] width

    def kernel(x_ref, w0_ref, wrest_ref, b_ref, out_ref):
        # x arrives in f32 (no wrapper-side bf16 HBM copy); cast once in VMEM.
        h = x_ref[...].astype(jnp.bfloat16)                          # (B, D_in)

        for l in range(num_layers):
            if l == 0:
                w = w0_ref[...]                                      # (D_in, 6H)
            else:
                off = (l - 1) * seg                                  # 128-aligned
                w = wrest_ref[:, off:off + g6]                       # (2H, 6H)
            b = b_ref[:, l * seg:l * seg + g6]                       # (1, 6H) f32
            # One MXU push covers both directions; accumulate in f32.
            gates = jnp.dot(h, w, preferred_element_type=jnp.float32) + b
            # H=32 -> 2H=64: half-vreg gate slices are unavoidable without
            # inflating the memory-bound layer-0 weight; kept compact.
            i = jax.nn.sigmoid(gates[:, 0 * h2:1 * h2])
            g = jnp.tanh(gates[:, 1 * h2:2 * h2])
            o = jax.nn.sigmoid(gates[:, 2 * h2:3 * h2])
            # c = i*g (c0 == 0, forget gate pruned); h = o * tanh(c).
            # Column order makes this directly [h_fwd | h_bwd] == next input.
            h = (o * jnp.tanh(i * g)).astype(jnp.bfloat16)           # (B, 2H)

        fc_off = (num_layers - 1) * seg                              # 128-aligned
        wfc = wrest_ref[:, fc_off:fc_off + fc_pad]                   # (2H, FC_PAD)
        bfc = b_ref[:, num_layers * seg:num_layers * seg + fc_pad]   # (1, FC_PAD)
        out_ref[...] = (jnp.dot(h, wfc, preferred_element_type=jnp.float32)
                        + bfc)                                       # (B, FC_PAD)

    return kernel


def bilstm_forward(params, x, num_classes):
    B = x.shape[0]
    # x.view(B, 1, -1): seq_len == 1, so work directly on (B, input_size), f32.
    xin = x.reshape(B, -1)

    w0, w_rest, b_all = params["w0"], params["w_rest"], params["b_all"]
    num_layers = params["num_layers"]
    H = params["hidden_size"]
    seg = params["seg"]
    d_in = xin.shape[1]
    assert d_in == w0.shape[0], "flattened input size must match layer-0 weight"

    # Advisory cost hint so XLA can overlap this latency-bound call with
    # neighboring ops.
    flops = 2 * B * (d_in * 6 * H + (num_layers - 1) * 2 * H * 6 * H
                     + 2 * H * _FC_PAD)
    transcendentals = B * num_layers * 4 * 2 * H
    bytes_accessed = (xin.size * 4 + w0.size * 2 + w_rest.size * 2
                      + b_all.size * 4 + B * _FC_PAD * 4)

    out = pl.pallas_call(
        _make_fused_kernel(num_layers, H, seg, _FC_PAD),
        out_shape=jax.ShapeDtypeStruct((B, _FC_PAD), jnp.float32),
        in_specs=[pl.BlockSpec(memory_space=pltpu.MemorySpace.VMEM)] * 4,
        out_specs=pl.BlockSpec(memory_space=pltpu.MemorySpace.VMEM),
        cost_estimate=pl.CostEstimate(flops=flops,
                                      transcendentals=transcendentals,
                                      bytes_accessed=bytes_accessed),
    )(xin, w0, w_rest, b_all)
    return out[:, :num_classes]


# ---------------------------------------------------------------------------
# Parameter init (deterministic, matches nn.LSTM / nn.Linear shapes), then
# fused / pruned / transposed / packed into the kernel's layout:
#   w0     : (input_size, 6H)                      bf16   (dominant weight)
#   w_rest : (2H, (L-1)*seg + FC_PAD)              bf16   (layers>=1 + fc, packed)
#   b_all  : (1,  L*seg + FC_PAD)                  f32    (all biases, packed)
# where seg = 6H rounded up to a 128-lane boundary.
# ---------------------------------------------------------------------------

def init_params(key, input_size, hidden_size, num_layers, num_classes):
    H = hidden_size
    g6 = 6 * H
    seg = pl.cdiv(g6, 128) * 128
    bound = 1.0 / (H ** 0.5)

    layer_ws, layer_bs = [], []
    for l in range(num_layers):
        d_in = input_size if l == 0 else 2 * H
        per_dir = []
        for _ in range(2):  # fwd, bwd
            key, k1, k2, k3 = jax.random.split(key, 4)
            w_ih = jax.random.uniform(k1, (4 * H, d_in), minval=-bound, maxval=bound)
            b_ih = jax.random.uniform(k2, (4 * H,), minval=-bound, maxval=bound)
            b_hh = jax.random.uniform(k3, (4 * H,), minval=-bound, maxval=bound)
            # W_hh exists in nn.LSTM but multiplies h0 == 0 (T == 1): omitted.
            b = b_ih + b_hh
            # PyTorch gate order along 4H is i, f, g, o; the forget gate only
            # multiplies c0 == 0 and is pruned (valid ONLY for zero init state,
            # T == 1 -- do not reuse this prep for seq_len > 1).
            per_dir.append((
                (w_ih[0:H], w_ih[2 * H:3 * H], w_ih[3 * H:4 * H]),
                (b[0:H], b[2 * H:3 * H], b[3 * H:4 * H]),
            ))
        (wf, bf), (wb, bb) = per_dir
        # Fused column order: [i_f, i_b | g_f, g_b | o_f, o_b]  -> (d_in, 6H)
        layer_ws.append(jnp.concatenate(
            [wf[0], wb[0], wf[1], wb[1], wf[2], wb[2]], axis=0).T)
        layer_bs.append(jnp.concatenate(
            [bf[0], bb[0], bf[1], bb[1], bf[2], bb[2]]))

    key, k1, k2 = jax.random.split(key, 3)
    fbound = 1.0 / ((2 * H) ** 0.5)
    w_fc = jax.random.uniform(k1, (num_classes, 2 * H), minval=-fbound, maxval=fbound)
    b_fc = jax.random.uniform(k2, (num_classes,), minval=-fbound, maxval=fbound)

    # Layer-0 weight stays its own (dominant) array, compact 6H columns.
    # (fp8 on v7x / int8 on v5e-v6e per-channel quantization would halve its
    #  HBM bytes; omitted to keep one portable code path.)
    w0 = jnp.asarray(layer_ws[0], jnp.bfloat16)

    # Pack layers >= 1 and the (lane-padded) fc weight into one array; each
    # segment starts on a 128-lane boundary so kernel slices stay aligned.
    rest_cols = (num_layers - 1) * seg + _FC_PAD
    w_rest = jnp.zeros((2 * H, rest_cols), jnp.float32)
    for l in range(1, num_layers):
        off = (l - 1) * seg
        w_rest = w_rest.at[:, off:off + g6].set(layer_ws[l])
    fc_off = (num_layers - 1) * seg
    w_rest = w_rest.at[:, fc_off:fc_off + num_classes].set(w_fc.T)
    w_rest = jnp.asarray(w_rest, jnp.bfloat16)

    # Pack all biases (layers 0..L-1 then fc, each segment 128-lane aligned).
    b_all = jnp.zeros((1, num_layers * seg + _FC_PAD), jnp.float32)
    for l in range(num_layers):
        b_all = b_all.at[0, l * seg:l * seg + g6].set(layer_bs[l])
    b_all = b_all.at[0, num_layers * seg:num_layers * seg + num_classes].set(b_fc)

    return {"w0": w0, "w_rest": w_rest, "b_all": b_all,
            "num_layers": num_layers, "hidden_size": H, "seg": seg}


# ---------------------------------------------------------------------------
# Demo
# ---------------------------------------------------------------------------

if __name__ == "__main__":
    B, C, Himg, Wimg = 2, 4, 16, 16          # input tensor (NCHW)
    input_size = C * Himg * Wimg             # 1024 after x.view(B, 1, -1)
    hidden_size = 32
    num_layers = 2
    num_classes = 5

    key = jax.random.PRNGKey(0)
    key, kx = jax.random.split(key)
    x = jax.random.normal(kx, (B, C, Himg, Wimg), dtype=jnp.float32)

    params = init_params(key, input_size, hidden_size, num_layers, num_classes)

    out = bilstm_forward(params, x, num_classes)
    out = jax.block_until_ready(out)
    assert out.shape == (B, num_classes), out.shape
    print("KERNEL_OK")
</pallas_src>

<mosaic_0001>
module attributes {stable_mosaic.version = 11 : i64} {
  func.func @kernel(%arg0: memref<2x1024xf32, #tpu.memory_space<vmem>>, %arg1: memref<1024x192xbf16, #tpu.memory_space<vmem>>, %arg2: memref<64x384xbf16, #tpu.memory_space<vmem>>, %arg3: memref<1x640xf32, #tpu.memory_space<vmem>>, %arg4: memref<2x128xf32, #tpu.memory_space<vmem>>) attributes {dimension_semantics = [], scalar_prefetch = 0 : i64, scratch_operands = 0 : i64, tpu.core_type = #tpu.core_type<tc>} {
    %c0 = arith.constant 0 : index
    %c0_0 = arith.constant 0 : index
    %0 = vector.load %arg0[%c0, %c0_0] : memref<2x1024xf32, #tpu.memory_space<vmem>>, vector<2x1024xf32>
    %1 = arith.truncf %0 : vector<2x1024xf32> to vector<2x1024xbf16>
    %c0_1 = arith.constant 0 : index
    %c0_2 = arith.constant 0 : index
    %2 = vector.load %arg1[%c0_1, %c0_2] : memref<1024x192xbf16, #tpu.memory_space<vmem>>, vector<1024x192xbf16>
    %c0_3 = arith.constant 0 : index
    %c0_4 = arith.constant 0 : index
    %3 = vector.load %arg3[%c0_3, %c0_4] : memref<1x640xf32, #tpu.memory_space<vmem>>, vector<1x192xf32>
    %cst = arith.constant dense<0.000000e+00> : vector<2x192xf32>
    %4 = tpu.matmul %1, %2, %cst {dimension_numbers = #tpu.dot_dimension_numbers<[1], [0], [0], [1], [0, 0, 1, 1], [], []>} : vector<2x1024xbf16>, vector<1024x192xbf16>, vector<2x192xf32> -> vector<2x192xf32>
    %5 = vector.broadcast %3 : vector<1x192xf32> to vector<2x192xf32>
    %6 = arith.addf %4, %5 : vector<2x192xf32>
    %7 = vector.extract_strided_slice %6 {offsets = [0, 0], sizes = [2, 64], strides = [1, 1]} : vector<2x192xf32> to vector<2x64xf32>
    %8 = arith.negf %7 : vector<2x64xf32>
    %9 = math.exp %8 : vector<2x64xf32>
    %cst_5 = arith.constant 1.000000e+00 : f32
    %10 = vector.broadcast %cst_5 : f32 to vector<2x64xf32>
    %11 = arith.addf %10, %9 : vector<2x64xf32>
    %12 = arith.divf %10, %11 : vector<2x64xf32>
    %13 = vector.extract_strided_slice %6 {offsets = [0, 64], sizes = [2, 64], strides = [1, 1]} : vector<2x192xf32> to vector<2x64xf32>
    %14 = math.tanh %13 : vector<2x64xf32>
    %15 = vector.extract_strided_slice %6 {offsets = [0, 128], sizes = [2, 64], strides = [1, 1]} : vector<2x192xf32> to vector<2x64xf32>
    %16 = arith.negf %15 : vector<2x64xf32>
    %17 = math.exp %16 : vector<2x64xf32>
    %cst_6 = arith.constant 1.000000e+00 : f32
    %18 = vector.broadcast %cst_6 : f32 to vector<2x64xf32>
    %19 = arith.addf %18, %17 : vector<2x64xf32>
    %20 = arith.divf %18, %19 : vector<2x64xf32>
    %21 = arith.mulf %12, %14 : vector<2x64xf32>
    %22 = math.tanh %21 : vector<2x64xf32>
    %23 = arith.mulf %20, %22 : vector<2x64xf32>
    %24 = arith.truncf %23 : vector<2x64xf32> to vector<2x64xbf16>
    %c0_7 = arith.constant 0 : index
    %c0_8 = arith.constant 0 : index
    %25 = vector.load %arg2[%c0_7, %c0_8] : memref<64x384xbf16, #tpu.memory_space<vmem>>, vector<64x192xbf16>
    %c0_9 = arith.constant 0 : index
    %c256 = arith.constant 256 : index
    %26 = vector.load %arg3[%c0_9, %c256] : memref<1x640xf32, #tpu.memory_space<vmem>>, vector<1x192xf32>
    %cst_10 = arith.constant dense<0.000000e+00> : vector<2x192xf32>
    %27 = tpu.matmul %24, %25, %cst_10 {dimension_numbers = #tpu.dot_dimension_numbers<[1], [0], [0], [1], [0, 0, 1, 1], [], []>} : vector<2x64xbf16>, vector<64x192xbf16>, vector<2x192xf32> -> vector<2x192xf32>
    %28 = vector.broadcast %26 : vector<1x192xf32> to vector<2x192xf32>
    %29 = arith.addf %27, %28 : vector<2x192xf32>
    %30 = vector.extract_strided_slice %29 {offsets = [0, 0], sizes = [2, 64], strides = [1, 1]} : vector<2x192xf32> to vector<2x64xf32>
    %31 = arith.negf %30 : vector<2x64xf32>
    %32 = math.exp %31 : vector<2x64xf32>
    %cst_11 = arith.constant 1.000000e+00 : f32
    %33 = vector.broadcast %cst_11 : f32 to vector<2x64xf32>
    %34 = arith.addf %33, %32 : vector<2x64xf32>
    %35 = arith.divf %33, %34 : vector<2x64xf32>
    %36 = vector.extract_strided_slice %29 {offsets = [0, 64], sizes = [2, 64], strides = [1, 1]} : vector<2x192xf32> to vector<2x64xf32>
    %37 = math.tanh %36 : vector<2x64xf32>
    %38 = vector.extract_strided_slice %29 {offsets = [0, 128], sizes = [2, 64], strides = [1, 1]} : vector<2x192xf32> to vector<2x64xf32>
    %39 = arith.negf %38 : vector<2x64xf32>
    %40 = math.exp %39 : vector<2x64xf32>
    %cst_12 = arith.constant 1.000000e+00 : f32
    %41 = vector.broadcast %cst_12 : f32 to vector<2x64xf32>
    %42 = arith.addf %41, %40 : vector<2x64xf32>
    %43 = arith.divf %41, %42 : vector<2x64xf32>
    %44 = arith.mulf %35, %37 : vector<2x64xf32>
    %45 = math.tanh %44 : vector<2x64xf32>
    %46 = arith.mulf %43, %45 : vector<2x64xf32>
    %47 = arith.truncf %46 : vector<2x64xf32> to vector<2x64xbf16>
    %c0_13 = arith.constant 0 : index
    %c256_14 = arith.constant 256 : index
    %48 = vector.load %arg2[%c0_13, %c256_14] : memref<64x384xbf16, #tpu.memory_space<vmem>>, vector<64x128xbf16>
    %c0_15 = arith.constant 0 : index
    %c512 = arith.constant 512 : index
    %49 = vector.load %arg3[%c0_15, %c512] : memref<1x640xf32, #tpu.memory_space<vmem>>, vector<1x128xf32>
    %cst_16 = arith.constant dense<0.000000e+00> : vector<2x128xf32>
    %50 = tpu.matmul %47, %48, %cst_16 {dimension_numbers = #tpu.dot_dimension_numbers<[1], [0], [0], [1], [0, 0, 1, 1], [], []>} : vector<2x64xbf16>, vector<64x128xbf16>, vector<2x128xf32> -> vector<2x128xf32>
    %51 = vector.broadcast %49 : vector<1x128xf32> to vector<2x128xf32>
    %52 = arith.addf %50, %51 : vector<2x128xf32>
    %c0_17 = arith.constant 0 : index
    %c0_18 = arith.constant 0 : index
    %53 = vector.load %arg4[%c0_17, %c0_18] : memref<2x128xf32, #tpu.memory_space<vmem>>, vector<2x128xf32>
    tpu.vector_store %arg4[%c0_17, %c0_18], %52 {strides = array<i32>} : memref<2x128xf32, #tpu.memory_space<vmem>>, vector<2x128xf32>,
    return
  }
}

</mosaic_0001>

<bundles_post_ra>
// kernel: tpu_custom_call.1
= control target key start
LH: loop header
LB: loop body
LE: loop exit
PB: predicated region body
PF: predicated region fallthrough
CT: control target
= control target key end

     0   :  { %v1701_v36 = vmov 1983009808   ;;  %v27_v38 = vlaneseq  ;;  %s2210_s0 = inlined_call_operand.vmem [shape: f32[2,1024], index: 0, kind: input, shape index: {}]   ;;  %s2211_s1 = inlined_call_operand.vmem [shape: bf16[1024,192], index: 1, kind: input, shape index: {}]   ;;  %s2212_s2 = inlined_call_operand.vmem [shape: bf16[64,384], index: 2, kind: input, shape index: {}]   ;;  %s2213_s3 = inlined_call_operand.vmem [shape: f32[1,640], index: 3, kind: input, shape index: {}]   ;;  %s2214_s4 = inlined_call_operand.hbm [shape: f32[2,128], index: 4, kind: output, shape index: {}]  }
   0x1   :  { %v1443_v0 = vld [vmem:[%s2211_s1 + $0x4] ss:$8 sps:$4 sm:$0xff]   ;;  %v1447_v2 = vld [vmem:[%s2211_s1] ss:$8 sps:$4 sm:$0xff]   ;;  %v1449_v4 = vld [vmem:[%s2211_s1 + $0x14] ss:$8 sps:$4 sm:$0xff]   ;;  %v25_v37 = vunpack.c.l.s4 %v1701_v36 }
   0x2   :  { %v1445_v1 = vld [vmem:[%s2211_s1 + $0x204] ss:$8 sps:$4 sm:$0xff]   ;;  %853 = vmatprep.subr.bf16.mxu1 %v1443_v0  ;;  %v1448_v3 = vld [vmem:[%s2211_s1 + $0x200] ss:$8 sps:$4 sm:$0xff]   ;;  %v1451_v5 = vld [vmem:[%s2211_s1 + $0x214] ss:$8 sps:$4 sm:$0xff]  }
   0x3   :  { %935 = vmatprep.subr.bf16.mxu0 %v1445_v1  ;;  %854 = vmatpush1.bf16.msra.mxu1 %v1447_v2  ;;  %v1453_v6 = vld [vmem:[%s2211_s1 + $0x10] ss:$8 sps:$4 sm:$0xff]   ;;  %v1455_v8 = vld [vmem:[%s2211_s1 + $0x24] ss:$8 sps:$4 sm:$0xff]   ;;  %v1459_v10 = vld [vmem:[%s2211_s1 + $0x20] ss:$8 sps:$4 sm:$0xff]   ;;  %v26_v42 = vunpack.c.0.s8 %v25_v37 }
   0x4   :  { %936 = vmatpush1.bf16.msra.mxu0 %v1448_v3  ;;  %855 = vmatprep.subr.bf16.mxu1 %v1449_v4  ;;  %v1454_v7 = vld [vmem:[%s2211_s1 + $0x210] ss:$8 sps:$4 sm:$0xff]   ;;  %v1457_v9 = vld [vmem:[%s2211_s1 + $0x224] ss:$8 sps:$4 sm:$0xff]   ;;  %v1460_v11 = vld [vmem:[%s2211_s1 + $0x220] ss:$8 sps:$4 sm:$0xff]  }
   0x5   :  { %937 = vmatprep.subr.bf16.mxu0 %v1451_v5  ;;  %v1461_v12 = vld [vmem:[%s2211_s1 + $0x34] ss:$8 sps:$4 sm:$0xff]   ;;  %v1465_v14 = vld [vmem:[%s2211_s1 + $0x30] ss:$8 sps:$4 sm:$0xff]   ;;  %v1467_v16 = vld [vmem:[%s2211_s1 + $0x44] ss:$8 sps:$4 sm:$0xff]  }
   0x6   :  { %v1463_v13 = vld [vmem:[%s2211_s1 + $0x234] ss:$8 sps:$4 sm:$0xff]   ;;  %v1466_v15 = vld [vmem:[%s2211_s1 + $0x230] ss:$8 sps:$4 sm:$0xff]   ;;  %v1469_v17 = vld [vmem:[%s2211_s1 + $0x244] ss:$8 sps:$4 sm:$0xff]  }
   0x7   :  { %856 = vmatpush1.bf16.msra.mxu1 %v1453_v6  ;;  %v1471_v18 = vld [vmem:[%s2211_s1 + $0x40] ss:$8 sps:$4 sm:$0xff]   ;;  %v1473_v20 = vld [vmem:[%s2211_s1 + $0x54] ss:$8 sps:$4 sm:$0xff]   ;;  %v1477_v22 = vld [vmem:[%s2211_s1 + $0x50] ss:$8 sps:$4 sm:$0xff]  }
   0x8   :  { %938 = vmatpush1.bf16.msra.mxu0 %v1454_v7  ;;  %857 = vmatprep.subr.bf16.mxu1 %v1455_v8  ;;  %v1472_v19 = vld [vmem:[%s2211_s1 + $0x240] ss:$8 sps:$4 sm:$0xff]   ;;  %v1475_v21 = vld [vmem:[%s2211_s1 + $0x254] ss:$8 sps:$4 sm:$0xff]   ;;  %v1478_v23 = vld [vmem:[%s2211_s1 + $0x250] ss:$8 sps:$4 sm:$0xff]  }
   0x9   :  { %939 = vmatprep.subr.bf16.mxu0 %v1457_v9  ;;  %v1479_v24 = vld [vmem:[%s2211_s1 + $0x64] ss:$8 sps:$4 sm:$0xff]   ;;  %v1483_v26 = vld [vmem:[%s2211_s1 + $0x60] ss:$8 sps:$4 sm:$0xff]   ;;  %v1485_v28 = vld [vmem:[%s2211_s1 + $0x74] ss:$8 sps:$4 sm:$0xff]  }
   0xa   :  { %v1481_v25 = vld [vmem:[%s2211_s1 + $0x264] ss:$8 sps:$4 sm:$0xff]   ;;  %v1484_v27 = vld [vmem:[%s2211_s1 + $0x260] ss:$8 sps:$4 sm:$0xff]   ;;  %v1487_v29 = vld [vmem:[%s2211_s1 + $0x274] ss:$8 sps:$4 sm:$0xff]  }
   0xb   :  { %858 = vmatpush1.bf16.msra.mxu1 %v1459_v10  ;;  %v1489_v30 = vld [vmem:[%s2211_s1 + $0x70] ss:$8 sps:$4 sm:$0xff]   ;;  %v1491_v32 = vld [vmem:[%s2211_s1 + $0x84] ss:$8 sps:$4 sm:$0xff]   ;;  %v1495_v34 = vld [vmem:[%s2211_s1 + $0x80] ss:$8 sps:$4 sm:$0xff]  }
   0xc   :  { %940 = vmatpush1.bf16.msra.mxu0 %v1460_v11  ;;  %859 = vmatprep.subr.bf16.mxu1 %v1461_v12  ;;  %v1490_v31 = vld [vmem:[%s2211_s1 + $0x270] ss:$8 sps:$4 sm:$0xff]   ;;  %v1493_v33 = vld [vmem:[%s2211_s1 + $0x284] ss:$8 sps:$4 sm:$0xff]   ;;  %v1496_v35 = vld [vmem:[%s2211_s1 + $0x280] ss:$8 sps:$4 sm:$0xff]  }
   0xd   :  { %941 = vmatprep.subr.bf16.mxu0 %v1463_v13  ;;  %v1497_v39 = vld [vmem:[%s2211_s1 + $0x94] ss:$8 sps:$4 sm:$0xff]   ;;  %v1501_v41 = vld [vmem:[%s2211_s1 + $0x90] ss:$8 sps:$4 sm:$0xff]   ;;  %v1849_v43 = vshrl.u32 %v27_v38, 7  ;;  %v19_v52 = vld [vmem:[%s2210_s0] sm:$0xff] }
   0xe   :  { %v1499_v40 = vld [vmem:[%s2211_s1 + $0x294] ss:$8 sps:$4 sm:$0xff]   ;;  %v1502_v44 = vld [vmem:[%s2211_s1 + $0x290] ss:$8 sps:$4 sm:$0xff]   ;;  %v1503_v45 = vld [vmem:[%s2211_s1 + $0xa4] ss:$8 sps:$4 sm:$0xff]   ;;  %v23_v8 = vcombine.high %v19_v52, %v19_v52 }
   0xf   :  { %860 = vmatpush1.bf16.msra.mxu1 %v1465_v14  ;;  %v1505_v46 = vld [vmem:[%s2211_s1 + $0x2a4] ss:$8 sps:$4 sm:$0xff]   ;;  %v1507_v47 = vld [vmem:[%s2211_s1 + $0xa0] ss:$8 sps:$4 sm:$0xff]   ;;  %v29_v49 = vsub.s32 %v26_v42, %v1849_v43  ;;  %v1509_v50 = vld [vmem:[%s2211_s1 + $0xb4] ss:$8 sps:$4 sm:$0xff]  }
  0x10   :  { %942 = vmatpush1.bf16.msra.mxu0 %v1466_v15  ;;  %861 = vmatprep.subr.bf16.mxu1 %v1467_v16  ;;  %v1508_v48 = vld [vmem:[%s2211_s1 + $0x2a0] ss:$8 sps:$4 sm:$0xff]   ;;  %v1511_v51 = vld [vmem:[%s2211_s1 + $0x2b4] ss:$8 sps:$4 sm:$0xff]   ;;  %v1513_v53 = vld [vmem:[%s2211_s1 + $0xb0] ss:$8 sps:$4 sm:$0xff]  }
  0x11   :  { %943 = vmatprep.subr.bf16.mxu0 %v1469_v17  ;;  %v1879_v54 = vrot.slane %v19_v52, %v29_v49  ;;  %v1514_v55 = vld [vmem:[%s2211_s1 + $0x2b0] ss:$8 sps:$4 sm:$0xff]   ;;  %v20_v56 = vld [vmem:[%s2210_s0 + $0x8] sm:$0xff]  ;;  %v1521_v1 = vld [vmem:[%s2211_s1 + $0xd4] ss:$8 sps:$4 sm:$0xff]   ;;  %v1931_v14 = vrot.slane %v23_v8, %v29_v49 }
  0x12   :  { %v1515_v57 = vld [vmem:[%s2211_s1 + $0xc4] ss:$8 sps:$4 sm:$0xff]   ;;  %v47_v60 = vrot.slane %v20_v56, %v29_v49  ;;  %v1519_v63 = vld [vmem:[%s2211_s1 + $0xc0] ss:$8 sps:$4 sm:$0xff]   ;;  %v1523_v2 = vld [vmem:[%s2211_s1 + $0x2d4] ss:$8 sps:$4 sm:$0xff]   ;;  %v40_v9 = vcombine.high %v20_v56, %v20_v56 }
  0x13   :  { %862 = vmatpush1.bf16.msra.mxu1 %v1471_v18  ;;  %v1517_v58 = vld [vmem:[%s2211_s1 + $0x2c4] ss:$8 sps:$4 sm:$0xff]   ;;  %v38_v59 = vcombine.high %v1879_v54, %v1879_v54  ;;  %v1520_v0 = vld [vmem:[%s2211_s1 + $0x2c0] ss:$8 sps:$4 sm:$0xff]   ;;  %v1525_v4 = vld [vmem:[%s2211_s1 + $0xd0] ss:$8 sps:$4 sm:$0xff]  }
  0x14   :  { %944 = vmatpush1.bf16.msra.mxu0 %v1472_v19  ;;  %863 = vmatprep.subr.bf16.mxu1 %v1473_v20  ;;  %v55_v62 = vcombine.high %v47_v60, %v47_v60  ;;  %v1526_v5 = vld [vmem:[%s2211_s1 + $0x2d0] ss:$8 sps:$4 sm:$0xff]   ;;  %v1527_v6 = vld [vmem:[%s2211_s1 + $0xe4] ss:$8 sps:$4 sm:$0xff]   ;;  %v1531_v10 = vld [vmem:[%s2211_s1 + $0xe0] ss:$8 sps:$4 sm:$0xff]   ;;  %v1933_v15 = vrot.slane %v40_v9, %v29_v49  ;;  %v39_v20 = vcombine.high %v1931_v14, %v1931_v14 }
  0x15   :  { %945 = vmatprep.subr.bf16.mxu0 %v1475_v21  ;;  %v66_v61 = vpack.c.bf16 %v38_v59, %v38_v59  ;;  %v1529_v7 = vld [vmem:[%s2211_s1 + $0x2e4] ss:$8 sps:$4 sm:$0xff]   ;;  %v1532_v11 = vld [vmem:[%s2211_s1 + $0x2e0] ss:$8 sps:$4 sm:$0xff]   ;;  %v1533_v12 = vld [vmem:[%s2211_s1 + $0xf4] ss:$8 sps:$4 sm:$0xff]  }
  0x16   :  { %v70_v3 = vpack.c.bf16 %v55_v62, %v55_v62  ;;  %v1535_v13 = vld [vmem:[%s2211_s1 + $0x2f4] ss:$8 sps:$4 sm:$0xff]   ;;  %v1537_v16 = vld [vmem:[%s2211_s1 + $0xf0] ss:$8 sps:$4 sm:$0xff]   ;;  %v1542_v18 = vld [vmem:[%s2211_s1 + $0x104] ss:$8 sps:$4 sm:$0xff]   ;;  %v56_v21 = vcombine.high %v1933_v15, %v1933_v15 }
  0x17   :  { %864 = vmatpush1.bf16.msra.mxu1 %v1477_v22  ;;  %885 = vmatprep.mubr.bf16.mxu1 %v66_v61  ;;  %v1538_v17 = vld [vmem:[%s2211_s1 + $0x2f0] ss:$8 sps:$4 sm:$0xff]   ;;  %v1546_v19 = vld [vmem:[%s2211_s1 + $0x304] ss:$8 sps:$4 sm:$0xff]   ;;  %v65_v22 = vpack.c.bf16 %v1879_v54, %v1879_v54  ;;  %v1561_v36 = vld [vmem:[%s2211_s1 + $0x134] ss:$8 sps:$4 sm:$0xff]  }
  0x18   :  { %946 = vmatpush1.bf16.msra.mxu0 %v1478_v23  ;;  %865 = vmatprep.subr.bf16.mxu1 %v1479_v24  ;;  %v69_v23 = vpack.c.bf16 %v47_v60, %v47_v60  ;;  %v1540_v24 = vld [vmem:[%s2211_s1 + $0x100] ss:$8 sps:$4 sm:$0xff]   ;;  %v1564_v37 = vld [vmem:[%s2211_s1 + $0x334] ss:$8 sps:$4 sm:$0xff]   ;;  %v1559_v38 = vld [vmem:[%s2211_s1 + $0x130] ss:$8 sps:$4 sm:$0xff]  }
  0x19   :  { %947 = vmatprep.subr.bf16.mxu0 %v1481_v25  ;;  %967 = vmatprep.mubr.bf16.mxu0 %v70_v3  ;;  %v1544_v25 = vld [vmem:[%s2211_s1 + $0x300] ss:$8 sps:$4 sm:$0xff]   ;;  %v1579_v49 = vld [vmem:[%s2211_s1 + $0x164] ss:$8 sps:$4 sm:$0xff]   ;;  %v1588_v54 = vld [vmem:[%s2211_s1 + $0x374] ss:$8 sps:$4 sm:$0xff]  }
  0x1a   :  { %v1565_v42 = vld [vmem:[%s2211_s1 + $0x140] ss:$8 sps:$4 sm:$0xff]  }
  0x1b   :  { %866 = vmatpush1.bf16.msra.mxu1 %v1483_v26  ;;  %v1549_v26 = vld [vmem:[%s2211_s1 + $0x114] ss:$8 sps:$4 sm:$0xff]   ;;  %v1580_v52 = vld [vmem:[%s2211_s1 + $0x360] ss:$8 sps:$4 sm:$0xff]  }
  0x1c   :  { %948 = vmatpush1.bf16.msra.mxu0 %v1484_v27  ;;  %867 = vmatprep.subr.bf16.mxu1 %v1485_v28  ;;  %v1552_v27 = vld [vmem:[%s2211_s1 + $0x314] ss:$8 sps:$4 sm:$0xff]   ;;  %v68_v28 = vpack.c.bf16 %v39_v20, %v39_v20 }
  0x1d   :  { %949 = vmatprep.subr.bf16.mxu0 %v1487_v29  ;;  %v72_v29 = vpack.c.bf16 %v56_v21, %v56_v21 }
  0x1f   :  { %868 = vmatpush1.bf16.msra.mxu1 %v1489_v30  ;;  %v1547_v30 = vld [vmem:[%s2211_s1 + $0x110] ss:$8 sps:$4 sm:$0xff]  }
  0x20   :  { %950 = vmatpush1.bf16.msra.mxu0 %v1490_v31  ;;  %869 = vmatprep.subr.bf16.mxu1 %v1491_v32  ;;  %v1550_v31 = vld [vmem:[%s2211_s1 + $0x310] ss:$8 sps:$4 sm:$0xff]   ;;  %v1555_v32 = vld [vmem:[%s2211_s1 + $0x124] ss:$8 sps:$4 sm:$0xff]  }
  0x21   :  { %951 = vmatprep.subr.bf16.mxu0 %v1493_v33  ;;  %v1558_v33 = vld [vmem:[%s2211_s1 + $0x324] ss:$8 sps:$4 sm:$0xff]  }
  0x23   :  { %870 = vmatpush1.bf16.msra.mxu1 %v1495_v34  ;;  %v1553_v34 = vld [vmem:[%s2211_s1 + $0x120] ss:$8 sps:$4 sm:$0xff]  }
  0x24   :  { %952 = vmatpush1.bf16.msra.mxu0 %v1496_v35  ;;  %871 = vmatprep.subr.bf16.mxu1 %v1497_v39  ;;  %v1556_v35 = vld [vmem:[%s2211_s1 + $0x320] ss:$8 sps:$4 sm:$0xff]   ;;  %v1562_v39 = vld [vmem:[%s2211_s1 + $0x330] ss:$8 sps:$4 sm:$0xff]  }
  0x25   :  { %953 = vmatprep.subr.bf16.mxu0 %v1499_v40  ;;  %v1567_v40 = vld [vmem:[%s2211_s1 + $0x144] ss:$8 sps:$4 sm:$0xff]  }
  0x27   :  { %872 = vmatpush1.bf16.msra.mxu1 %v1501_v41  ;;  %v1570_v41 = vld [vmem:[%s2211_s1 + $0x344] ss:$8 sps:$4 sm:$0xff]  }
  0x28   :  { %954 = vmatpush1.bf16.msra.mxu0 %v1502_v44  ;;  %873 = vmatprep.subr.bf16.mxu1 %v1503_v45  ;;  %v1568_v44 = vld [vmem:[%s2211_s1 + $0x340] ss:$8 sps:$4 sm:$0xff]   ;;  %v1573_v45 = vld [vmem:[%s2211_s1 + $0x154] ss:$8 sps:$4 sm:$0xff]  }
  0x29   :  { %955 = vmatprep.subr.bf16.mxu0 %v1505_v46  ;;  %v1576_v46 = vld [vmem:[%s2211_s1 + $0x354] ss:$8 sps:$4 sm:$0xff]  }
  0x2b   :  { %874 = vmatpush1.bf16.msra.mxu1 %v1507_v47  ;;  %v1571_v47 = vld [vmem:[%s2211_s1 + $0x150] ss:$8 sps:$4 sm:$0xff]  }
  0x2c   :  { %956 = vmatpush1.bf16.msra.mxu0 %v1508_v48  ;;  %875 = vmatprep.subr.bf16.mxu1 %v1509_v50  ;;  %v1574_v48 = vld [vmem:[%s2211_s1 + $0x350] ss:$8 sps:$4 sm:$0xff]   ;;  %v1582_v50 = vld [vmem:[%s2211_s1 + $0x364] ss:$8 sps:$4 sm:$0xff]  }
  0x2d   :  { %957 = vmatprep.subr.bf16.mxu0 %v1511_v51  ;;  %v1577_v51 = vld [vmem:[%s2211_s1 + $0x160] ss:$8 sps:$4 sm:$0xff]  }
  0x2f   :  { %876 = vmatpush1.bf16.msra.mxu1 %v1513_v53  ;;  %v1585_v53 = vld [vmem:[%s2211_s1 + $0x174] ss:$8 sps:$4 sm:$0xff]  }
  0x30   :  { %958 = vmatpush1.bf16.msra.mxu0 %v1514_v55  ;;  %877 = vmatprep.subr.bf16.mxu1 %v1515_v57 }
  0x31   :  { %959 = vmatprep.subr.bf16.mxu0 %v1517_v58 }
  0x33   :  { %878 = vmatpush1.bf16.msra.mxu1 %v1519_v63 }
  0x34   :  { %960 = vmatpush1.bf16.msra.mxu0 %v1520_v0  ;;  %879 = vmatprep.subr.bf16.mxu1 %v1521_v1 }
  0x35   :  { %961 = vmatprep.subr.bf16.mxu0 %v1523_v2 }
  0x37   :  { %880 = vmatpush1.bf16.msra.mxu1 %v1525_v4 }
  0x38   :  { %962 = vmatpush1.bf16.msra.mxu0 %v1526_v5  ;;  %881 = vmatprep.subr.bf16.mxu1 %v1527_v6 }
  0x39   :  { %963 = vmatprep.subr.bf16.mxu0 %v1529_v7 }
  0x3b   :  { %882 = vmatpush1.bf16.msra.mxu1 %v1531_v10 }
  0x3c   :  { %964 = vmatpush1.bf16.msra.mxu0 %v1532_v11  ;;  %883 = vmatprep.subr.bf16.mxu1 %v1533_v12 }
  0x3d   :  { %965 = vmatprep.subr.bf16.mxu0 %v1535_v13 }
  0x3f   :  { %884 = vmatpush1.bf16.msra.mxu1 %v1537_v16 }
  0x40   :  { %966 = vmatpush1.bf16.msra.mxu0 %v1538_v17  ;;  %894 = vmatprep.subr.bf16.mxu1 %v1542_v18 }
  0x41   :  { %976 = vmatprep.subr.bf16.mxu0 %v1546_v19 }
  0x42   :  { %886 = vmatmul.mubr.bf16.vlgmr.msra.gmra.mrb[0].mxu1 %v65_v22 }
  0x43   :  { %968 = vmatmul.mubr.bf16.vlgmr.msra.gmra.mrb[0].mxu0 %v69_v23  ;;  %895 = vmatpush1.bf16.msra.mxu1 %v1540_v24 }
  0x44   :  { %977 = vmatpush1.bf16.msra.mxu0 %v1544_v25  ;;  %896 = vmatprep.subr.bf16.mxu1 %v1549_v26 }
  0x45   :  { %978 = vmatprep.subr.bf16.mxu0 %v1552_v27  ;;  %926 = vmatprep.mubr.bf16.mxu1 %v68_v28 }
  0x46   :  { %1008 = vmatprep.mubr.bf16.mxu0 %v72_v29 }
  0x47   :  { %897 = vmatpush1.bf16.msra.mxu1 %v1547_v30 }
  0x48   :  { %979 = vmatpush1.bf16.msra.mxu0 %v1550_v31  ;;  %898 = vmatprep.subr.bf16.mxu1 %v1555_v32 }
  0x49   :  { %980 = vmatprep.subr.bf16.mxu0 %v1558_v33 }
  0x4b   :  { %899 = vmatpush1.bf16.msra.mxu1 %v1553_v34 }
  0x4c   :  { %981 = vmatpush1.bf16.msra.mxu0 %v1556_v35  ;;  %900 = vmatprep.subr.bf16.mxu1 %v1561_v36 }
  0x4d   :  { %982 = vmatprep.subr.bf16.mxu0 %v1564_v37 }
  0x4f   :  { %901 = vmatpush1.bf16.msra.mxu1 %v1559_v38 }
  0x50   :  { %983 = vmatpush1.bf16.msra.mxu0 %v1562_v39  ;;  %902 = vmatprep.subr.bf16.mxu1 %v1567_v40 }
  0x51   :  { %984 = vmatprep.subr.bf16.mxu0 %v1570_v41 }
  0x53   :  { %903 = vmatpush1.bf16.msra.mxu1 %v1565_v42 }
  0x54   :  { %985 = vmatpush1.bf16.msra.mxu0 %v1568_v44  ;;  %904 = vmatprep.subr.bf16.mxu1 %v1573_v45 }
  0x55   :  { %986 = vmatprep.subr.bf16.mxu0 %v1576_v46 }
  0x57   :  { %905 = vmatpush1.bf16.msra.mxu1 %v1571_v47 }
  0x58   :  { %987 = vmatpush1.bf16.msra.mxu0 %v1574_v48  ;;  %906 = vmatprep.subr.bf16.mxu1 %v1579_v49 }
  0x59   :  { %988 = vmatprep.subr.bf16.mxu0 %v1582_v50 }
  0x5a   :  { %9 = vsyncpa [#allocation3], 0  ;;  %v1583_v55 = vld [vmem:[%s2211_s1 + $0x170] ss:$8 sps:$4 sm:$0xff]   ;;  %v1591_v57 = vld [vmem:[%s2211_s1 + $0x184] ss:$8 sps:$4 sm:$0xff]   ;;  %v67_v27 = vpack.c.bf16 %v1931_v14, %v1931_v14  ;;  %v71_v28 = vpack.c.bf16 %v1933_v15, %v1933_v15 }
  0x5b   :  { %907 = vmatpush1.bf16.msra.mxu1 %v1577_v51  ;;  %v1586_v56 = vld [vmem:[%s2211_s1 + $0x370] ss:$8 sps:$4 sm:$0xff]   ;;  %v1594_v58 = vld [vmem:[%s2211_s1 + $0x384] ss:$8 sps:$4 sm:$0xff]   ;;  %v1589_v59 = vld [vmem:[%s2211_s1 + $0x180] ss:$8 sps:$4 sm:$0xff]  }
  0x5c   :  { %989 = vmatpush1.bf16.msra.mxu0 %v1580_v52  ;;  %908 = vmatprep.subr.bf16.mxu1 %v1585_v53  ;;  %v1592_v60 = vld [vmem:[%s2211_s1 + $0x380] ss:$8 sps:$4 sm:$0xff]   ;;  %v1597_v61 = vld [vmem:[%s2211_s1 + $0x194] ss:$8 sps:$4 sm:$0xff]   ;;  %v1595_v63 = vld [vmem:[%s2211_s1 + $0x190] ss:$8 sps:$4 sm:$0xff]  }
  0x5d   :  { %990 = vmatprep.subr.bf16.mxu0 %v1588_v54  ;;  %v1600_v62 = vld [vmem:[%s2211_s1 + $0x394] ss:$8 sps:$4 sm:$0xff]   ;;  %v1598_v0 = vld [vmem:[%s2211_s1 + $0x390] ss:$8 sps:$4 sm:$0xff]   ;;  %v1603_v1 = vld [vmem:[%s2211_s1 + $0x1a4] ss:$8 sps:$4 sm:$0xff]  }
  0x5e   :  { %v1606_v2 = vld [vmem:[%s2211_s1 + $0x3a4] ss:$8 sps:$4 sm:$0xff]   ;;  %v1601_v3 = vld [vmem:[%s2211_s1 + $0x1a0] ss:$8 sps:$4 sm:$0xff]   ;;  %v1609_v5 = vld [vmem:[%s2211_s1 + $0x1b4] ss:$8 sps:$4 sm:$0xff]  }
  0x5f   :  { %909 = vmatpush1.bf16.msra.mxu1 %v1583_v55  ;;  %v1604_v4 = vld [vmem:[%s2211_s1 + $0x3a0] ss:$8 sps:$4 sm:$0xff]   ;;  %v1612_v6 = vld [vmem:[%s2211_s1 + $0x3b4] ss:$8 sps:$4 sm:$0xff]   ;;  %v1607_v7 = vld [vmem:[%s2211_s1 + $0x1b0] ss:$8 sps:$4 sm:$0xff]  }
  0x60   :  { %991 = vmatpush1.bf16.msra.mxu0 %v1586_v56  ;;  %910 = vmatprep.subr.bf16.mxu1 %v1591_v57  ;;  %v1610_v8 = vld [vmem:[%s2211_s1 + $0x3b0] ss:$8 sps:$4 sm:$0xff]   ;;  %v1615_v9 = vld [vmem:[%s2211_s1 + $0x1c4] ss:$8 sps:$4 sm:$0xff]   ;;  %v1613_v11 = vld [vmem:[%s2211_s1 + $0x1c0] ss:$8 sps:$4 sm:$0xff]  }
  0x61   :  { %992 = vmatprep.subr.bf16.mxu0 %v1594_v58  ;;  %v1618_v10 = vld [vmem:[%s2211_s1 + $0x3c4] ss:$8 sps:$4 sm:$0xff]   ;;  %v1616_v12 = vld [vmem:[%s2211_s1 + $0x3c0] ss:$8 sps:$4 sm:$0xff]   ;;  %v1621_v13 = vld [vmem:[%s2211_s1 + $0x1d4] ss:$8 sps:$4 sm:$0xff]  }
  0x62   :  { %v1624_v16 = vld [vmem:[%s2211_s1 + $0x3d4] ss:$8 sps:$4 sm:$0xff]   ;;  %v1619_v17 = vld [vmem:[%s2211_s1 + $0x1d0] ss:$8 sps:$4 sm:$0xff]   ;;  %v1627_v19 = vld [vmem:[%s2211_s1 + $0x1e4] ss:$8 sps:$4 sm:$0xff]  }
  0x63   :  { %911 = vmatpush1.bf16.msra.mxu1 %v1589_v59  ;;  %v1622_v18 = vld [vmem:[%s2211_s1 + $0x3d0] ss:$8 sps:$4 sm:$0xff]   ;;  %v1630_v20 = vld [vmem:[%s2211_s1 + $0x3e4] ss:$8 sps:$4 sm:$0xff]   ;;  %v1625_v21 = vld [vmem:[%s2211_s1 + $0x1e0] ss:$8 sps:$4 sm:$0xff]  }
  0x64   :  { %993 = vmatpush1.bf16.msra.mxu0 %v1592_v60  ;;  %912 = vmatprep.subr.bf16.mxu1 %v1597_v61  ;;  %v1628_v22 = vld [vmem:[%s2211_s1 + $0x3e0] ss:$8 sps:$4 sm:$0xff]   ;;  %v1633_v23 = vld [vmem:[%s2211_s1 + $0x1f4] ss:$8 sps:$4 sm:$0xff]   ;;  %v1631_v25 = vld [vmem:[%s2211_s1 + $0x1f0] ss:$8 sps:$4 sm:$0xff]  }
  0x65   :  { %994 = vmatprep.subr.bf16.mxu0 %v1600_v62  ;;  %v1636_v24 = vld [vmem:[%s2211_s1 + $0x3f4] ss:$8 sps:$4 sm:$0xff]   ;;  %v1634_v26 = vld [vmem:[%s2211_s1 + $0x3f0] ss:$8 sps:$4 sm:$0xff]   ;;  %v205_v29 = vsub.s32 0, %v1849_v43  ;;  %v209_v31 = vsub.s32 1, %v1849_v43 }
  0x66   :  { %v201_v30 = vld [vmem:[%s2213_s3] sm:$0x3]  ;;  %v1639_v40 = vld [vmem:[%s2212_s2 + $0x4] ss:$12 sps:$4 sm:$0xff]   ;;  %v1642_v47 = vld [vmem:[%s2212_s2 + $0x1c] ss:$12 sps:$4 sm:$0xff]  }
  0x67   :  { %913 = vmatpush1.bf16.msra.mxu1 %v1595_v63  ;;  %v206_v32 = vrot.slane %v201_v30, %v205_v29  ;;  %v210_v33 = vrot.slane %v201_v30, %v209_v31  ;;  %v1637_v45 = vld [vmem:[%s2212_s2] ss:$12 sps:$4 sm:$0xff]   ;;  %v1640_v48 = vld [vmem:[%s2212_s2 + $0x18] ss:$12 sps:$4 sm:$0xff]   ;;  %v1643_v50 = vld [vmem:[%s2212_s2 + $0x30] ss:$12 sps:$4 sm:$0xff]  }
  0x68   :  { %995 = vmatpush1.bf16.msra.mxu0 %v1598_v0  ;;  %914 = vmatprep.subr.bf16.mxu1 %v1603_v1  ;;  %v1645_v49 = vld [vmem:[%s2212_s2 + $0x34] ss:$12 sps:$4 sm:$0xff]   ;;  %v1648_v51 = vld [vmem:[%s2212_s2 + $0x4c] ss:$12 sps:$4 sm:$0xff]   ;;  %s1702_s25 = smov 64   ;;  %v1703_v54 = vmov 0  }
  0x69   :  { %996 = vmatprep.subr.bf16.mxu0 %v1606_v2  ;;  %v1646_v53 = vld [vmem:[%s2212_s2 + $0x48] ss:$12 sps:$4 sm:$0xff]   ;;  %vm1098_vm0 = vcmask 523264   ;;  %vm1705_vm1 = vmmov 0   ;;  %v1402_v43 = vld [vmem:[%s2213_s3 + $0x4] ss:$0 sm:$0xff] }
  0x6a   :  { %s1706_s1 = smov [#allocation2]  }
  0x6b   :  { %915 = vmatpush1.bf16.msra.mxu1 %v1601_v3  ;;  %s1253_s11 = sshll.u32 %s1706_s1, 4  ;;  %s1254_s11 = int_to_ptr.vmem [resolvable:$true] %s1253_s11 }
  0x6c   :  { %997 = vmatpush1.bf16.msra.mxu0 %v1604_v4  ;;  %916 = vmatprep.subr.bf16.mxu1 %v1609_v5  ;;  %v1046_v4 = vld [vmem:[%s2213_s3 + $0x2] sm:$0x3]  ;;  %s1677_s12 = scalar_lea.vmem %s1254_s11, 32  ;;  %p1682_p1 = scmp.lt.s32.totalorder %s1254_s11, %s1254_s11 }
  0x6d   :  { %998 = vmatprep.subr.bf16.mxu0 %v1612_v6  ;;  %v1051_v5 = vrot.slane %v1046_v4, %v205_v29  ;;  %p1678_p0 = scmp.ne.s32.totalorder %s1254_s11, %s1677_s12  ;;  %p1683_p2 = scmp.lt.s32.totalorder %s1677_s12, %s1677_s12 }
  0x6f   :  { %917 = vmatpush1.bf16.msra.mxu1 %v1607_v7  ;;  %p1684_p3 = por %p1683_p2, %p1682_p1 }
  0x70   :  { %999 = vmatpush1.bf16.msra.mxu0 %v1610_v8  ;;  %918 = vmatprep.subr.bf16.mxu1 %v1615_v9  ;;  %v1649_v9 = vld [vmem:[%s2212_s2 + $0x8] ss:$12 sps:$4 sm:$0xff]  }
  0x71   :  { %1000 = vmatprep.subr.bf16.mxu0 %v1618_v10  ;;  %p1685_p4 = pnand %p1684_p3, %p1678_p0 }
  0x73   :  { %919 = vmatpush1.bf16.msra.mxu1 %v1613_v11  ;;  %v1704_v11 = vmov 0.0  }
  0x74   :  { %1001 = vmatpush1.bf16.msra.mxu0 %v1616_v12  ;;  %920 = vmatprep.subr.bf16.mxu1 %v1621_v13  ;;  %v1650_v13 = vld [vmem:[%s2212_s2 + $0x20] ss:$12 sps:$4 sm:$0xff]  }
  0x75   :  { %1002 = vmatprep.subr.bf16.mxu0 %v1624_v16  ;;  %v1651_v16 = vld [vmem:[%s2212_s2 + $0x38] ss:$12 sps:$4 sm:$0xff]  }
  0x77   :  { %921 = vmatpush1.bf16.msra.mxu1 %v1619_v17 }
  0x78   :  { %1003 = vmatpush1.bf16.msra.mxu0 %v1622_v18  ;;  %922 = vmatprep.subr.bf16.mxu1 %v1627_v19  ;;  %v1652_v18 = vld [vmem:[%s2212_s2 + $0x50] ss:$12 sps:$4 sm:$0xff]  }
  0x79   :  { %1004 = vmatprep.subr.bf16.mxu0 %v1630_v20  ;;  %v1055_v20 = vrot.slane %v1046_v4, %v209_v31 }
  0x7b   :  { %923 = vmatpush1.bf16.msra.mxu1 %v1625_v21 }
  0x7c   :  { %1005 = vmatpush1.bf16.msra.mxu0 %v1628_v22  ;;  %924 = vmatprep.subr.bf16.mxu1 %v1633_v23 }
  0x7d   :  { %1006 = vmatprep.subr.bf16.mxu0 %v1636_v24 }
  0x7f   :  { %925 = vmatpush1.bf16.msra.mxu1 %v1631_v25 }
  0x80   :  { %1007 = vmatpush1.bf16.msra.mxu0 %v1634_v26  ;;  %1413 = vmatprep.subr.bf16.mxu1 %v1704_v11 }
  0x81   :  { %1102 = vmatprep.subr.bf16.mxu0 %v1639_v40 }
  0x82   :  { %927 = vmatmul.mubr.bf16.vlgmr.msra.gmra.mrb[0].mxu1 %v67_v27 }
  0x83   :  { %1009 = vmatmul.mubr.bf16.vlgmr.msra.gmra.mrb[0].mxu0 %v71_v28  ;;  %1414 = vmatpush3.bf16.msra.mxu1 %v1649_v9 }
  0x84   :  { %1103 = vmatpush1.bf16.msra.mxu0 %v1637_v45  ;;  %1134 = vmatprep.mubr.bf16.mxu0 %v1703_v54 }
  0x85   :  { %1104 = vmatprep.subr.bf16.mxu0 %v1642_v47  ;;  %1415 = vmatprep.subr.bf16.mxu1 %v1704_v11 }
  0x86   :  { %1421 = vmatprep.mubr.msk.bf16.mxu1 %vm1705_vm1, %v1704_v11 }
  0x87   :  { %1416 = vmatpush3.bf16.msra.mxu1 %v1650_v13 }
  0x88   :  { %1105 = vmatpush1.bf16.msra.mxu0 %v1640_v48  ;;  %1417 = vmatprep.subr.bf16.mxu1 %v1704_v11 }
  0x89   :  { %1106 = vmatprep.subr.bf16.mxu0 %v1645_v49 }
  0x8b   :  { %1418 = vmatpush3.bf16.msra.mxu1 %v1651_v16 }
  0x8c   :  { %1107 = vmatpush1.bf16.msra.mxu0 %v1643_v50  ;;  %1419 = vmatprep.subr.bf16.mxu1 %v1704_v11 }
  0x8d   :  { %1108 = vmatprep.subr.bf16.mxu0 %v1648_v51 }
  0x8f   :  { %1420 = vmatpush3.bf16.msra.mxu1 %v1652_v18 }
  0x90   :  { %1109 = vmatpush1.bf16.msra.mxu0 %v1646_v53 }
 0x155   :  { %v928_v14 = vpop.f32.mrb[0].mxu1 }
 0x156   :  { %v1010_v34 = vpop.f32.mrb[0].mxu0  ;;  %v1425_v35 = vadd.f32 %v928_v14, %v206_v32  ;;  %v930_v15 = vpop.f32.mrb[1].mxu1 }
 0x157   :  { %v1012_v36 = vpop.f32.mrb[1].mxu0  ;;  %v1427_v37 = vadd.f32 %v930_v15, %v210_v33  ;;  %v932_v38 = vpop.f32.mrb[2].mxu1 }
 0x158   :  { %v1014_v39 = vpop.f32.mrb[2].mxu0  ;;  %v1426_v41 = vadd.f32 %v1425_v35, %v1010_v34  ;;  %v933_v42 = vpop.f32.mrb[3].mxu1 }
 0x159   :  { %v1015_v44 = vpop.f32.mrb[3].mxu0  ;;  %v1428_v46 = vadd.f32 %v1427_v37, %v1012_v36 }
 0x15a   :  { %1653 = vtanh.f32 %v1426_v41  ;;  %v1389_v55 = vmul.f32 -1.442695, %v1426_v41 }
 0x15b   :  { %v1390_v56 = vmul.f32 -1.442695, %v1428_v46 }
 0x15c   :  { %1655 = vpow2.f32 %v1389_v55 }
 0x15d   :  { %1657 = vpow2.f32 %v1390_v56 }
 0x164   :  { %v1654_v52 = vpop.eup %1653 }
 0x165   :  { %1031 = vrot.lane.b32.xlu0 %v1654_v52, %s1702_s25 }
 0x166   :  { %v1656_v57 = vpop.eup %1655 }
 0x167   :  { %v1020_v58 = vadd.f32 1.0, %v1656_v57  ;;  %v1658_v59 = vpop.eup %1657 }
 0x168   :  { %v1027_v60 = vadd.f32 1.0, %v1658_v59 }
 0x169   :  { %1659 = vrcp.f32 %v1020_v58 }
 0x16a   :  { %1661 = vrcp.f32 %v1027_v60 }
 0x173   :  { %v1660_v61 = vpop.eup %1659 }
 0x174   :  { %v1662_v0 = vpop.eup %1661 }
 0x1d7   :  { %v1032_v62 = vpop.permute.xlu0 %1031 }
 0x1d8   :  { %v1034_v63 = vmul.f32 %v1660_v61, %v1032_v62 }
 0x1da   :  { %1663 = vtanh.f32 %v1034_v63 }
 0x1e4   :  { %v1664_v1 = vpop.eup %1663 }
 0x1e5   :  { %v1036_v2 = vmul.f32 %v1664_v1, %v1662_v0 }
 0x1e7   :  { %v1037_v3 = vpack.c.bf16 %v1036_v2, %v1036_v2 }
 0x1e9   :  { %1399 = vmatmul.mubr.msk.bf16.vlgmr.msra.gmra.mrb[4].mxu0 %vm1098_vm0, %v1037_v3 }
 0x2bc   :  { %v1136_v6 = vpop.f32.mrb[4].mxu0 }
 0x2bd   :  { %v1137_v7 = vadd.f32 %v1136_v6, %v1051_v5  ;;  %v1138_v8 = vpop.f32.mrb[5].mxu0 }
 0x2be   :  { %v1140_v10 = vpop.f32.mrb[6].mxu0  ;;  %v1139_v21 = vadd.f32 %v1138_v8, %v1055_v20 }
 0x2bf   :  { %1665 = vtanh.f32 %v1137_v7  ;;  %v1141_v12 = vpop.f32.mrb[7].mxu0  ;;  %v1400_v19 = vmul.f32 -1.442695, %v1137_v7 }
 0x2c0   :  { %v1401_v22 = vmul.f32 -1.442695, %v1139_v21 }
 0x2c1   :  { %1667 = vpow2.f32 %v1400_v19 }
 0x2c2   :  { %1669 = vpow2.f32 %v1401_v22 }
 0x2c9   :  { %v1666_v17 = vpop.eup %1665 }
 0x2ca   :  { %1157 = vrot.lane.b32.xlu0 %v1666_v17, %s1702_s25 }
 0x2cb   :  { %v1668_v23 = vpop.eup %1667 }
 0x2cc   :  { %v1146_v24 = vadd.f32 1.0, %v1668_v23  ;;  %v1670_v25 = vpop.eup %1669 }
 0x2cd   :  { %v1153_v26 = vadd.f32 1.0, %v1670_v25 }
 0x2ce   :  { %1671 = vrcp.f32 %v1146_v24 }
 0x2cf   :  { %1673 = vrcp.f32 %v1153_v26 }
 0x2d8   :  { %v1672_v27 = vpop.eup %1671 }
 0x2d9   :  { %v1674_v30 = vpop.eup %1673 }
 0x33c   :  { %v1158_v28 = vpop.permute.xlu0 %1157 }
 0x33d   :  { %v1160_v29 = vmul.f32 %v1672_v27, %v1158_v28 }
 0x33f   :  { %1675 = vtanh.f32 %v1160_v29 }
 0x349   :  { %v1676_v32 = vpop.eup %1675 }
 0x34a   :  { %v1162_v33 = vmul.f32 %v1676_v32, %v1674_v30 }
 0x34c   :  { %v1163_v14 = vpack.c.bf16 %v1162_v33, %v1162_v33 }
 0x34e   :  { %1422 = vmatmul.mubr.msk.bf16.vlgmr.msra.gmra.mrb[4].mxu1 %vm1098_vm0, %v1163_v14 }
 0x421   :  { %v1240_v31 = vpop.f32.mrb[4].mxu1 }
 0x422   :  { %v1241_v34 = vadd.f32 %v1402_v43, %v1240_v31  ;;  %v1423_v35 = vpop.f32.mrb[5].mxu1 }
 0x423   :  { %v1243_v15 = vpop.f32.mrb[6].mxu1 }
 0x424   :  { %1246 = vst [vmem:[#allocation2] sm:$0x3] %v1241_v34  ;;  %v1424_v36 = vpop.f32.mrb[7].mxu1 }
 0x425   :  { %1688 = shalt.err (!%p1685_p4)
}
 0x426   :  { %s1689_s3 = scalar_lea.hbm %s2214_s4, 32 }
 0x427   :  { %p1690_p5 = scmp.ne.s32.totalorder %s2214_s4, %s1689_s3  ;;  %p1693_p6 = scmp.lt.u32.totalorder %s1689_s3, %s2214_s4 }
 0x429   :  { %p1695_p7 = pnand %p1693_p6, %p1690_p5 }
 0x42b   :  { %1698 = shalt.err (!%p1695_p7)
}
 0x42c   :  { %1256 = dma.vmem_to_hbm [thread:$0]  %s1254_s11, 32, %s2214_s4, [#allocation3]  }
 0x42d   :  { %1699 = dma.done.wait [#allocation3], 32  }
 0x42e   :  { %1700 = vsyncadd [#allocation3], 4294967264 }
 0x42f   :  { %1260 = vsyncpa [#allocation3], 1 }

</bundles_post_ra>
